<compile_context>
chip_gen: v7x
topology: tpu7x:2x2x1
jax: 0.10.0
libtpu: 0.0.40
codegen_flags: <defaults>
</compile_context>

<pallas_src>
import jax
import jax.numpy as jnp
from jax.experimental import pallas as pl
from jax.experimental.pallas import tpu as pltpu


def nlinet_kernel(s1_ref, wc_ref, bc_ref, out_ref, umax_ref):
    """One (batch-tile, time-tile) grid step.

    s1_ref  : (TB, TT, E)  compute dtype  -- streamed input tile
    wc_ref  : (E, NPAD)    compute dtype  -- collapsed classifier weight (resident)
    bc_ref  : (1, NPAD)    f32            -- collapsed classifier bias (resident)
    out_ref : (TB, NPAD)   f32            -- logits tile (written at last t)
    umax_ref: (TB, E)      compute dtype  -- running max-pool accumulator
    """
    t = pl.program_id(1)

    @pl.when(t == 0)
    def _init():
        umax_ref[...] = jnp.full_like(umax_ref, -jnp.inf)

    # Encoder: running max-pool over this time tile (sublane reduction, XLU).
    umax_ref[...] = jnp.maximum(umax_ref[...], jnp.max(s1_ref[...], axis=1))

    @pl.when(t == pl.num_programs(1) - 1)
    def _finalize():
        logits = jnp.dot(umax_ref[...], wc_ref[...],
                         preferred_element_type=jnp.float32)
        out_ref[...] = (logits + bc_ref[...]).astype(out_ref.dtype)


def nlinet_forward(s1, params, *, block_b=128, block_t=128,
                   compute_dtype=jnp.bfloat16):
    """NLINet forward (nonlinear_fc=False, eval). s1: (B, T, 320) float32.

    Returns logits of shape (B, n_classes), float32.
    """
    w1, b1, w2, b2, w3, b3 = params
    B, T, E = s1.shape
    n_classes = w3.shape[1]

    # --- collapse the activation-free classifier (exact algebra, f32) -------
    wc = w1 @ w2 @ w3                       # (E, n_classes)
    bc = b1 @ w2 @ w3 + b2 @ w3 + b3        # (1, n_classes)

    # --- lane-pad the output dim to a full 128-lane tile ---------------------
    n_pad = pl.cdiv(n_classes, 128) * 128
    wc = jnp.pad(wc, ((0, 0), (0, n_pad - n_classes)))
    bc = jnp.pad(bc, ((0, 0), (0, n_pad - n_classes)))

    # --- tile sizes & input padding ------------------------------------------
    block_b = min(block_b, B)
    block_t = min(block_t, T)
    b_padded = pl.cdiv(B, block_b) * block_b
    t_padded = pl.cdiv(T, block_t) * block_t

    s1p = s1
    if t_padded != T:   # -inf: neutral element for the max-pool
        s1p = jnp.pad(s1p, ((0, 0), (0, t_padded - T), (0, 0)),
                      constant_values=-jnp.inf)
    if b_padded != B:   # zeros: the extra logit rows are sliced off below
        s1p = jnp.pad(s1p, ((0, b_padded - B), (0, 0), (0, 0)))

    # --- dtype: stream bf16 (half the HBM bytes), accumulate in f32 ----------
    s1p = s1p.astype(compute_dtype)
    wc = wc.astype(compute_dtype)
    bc = bc.astype(jnp.float32)

    grid = (b_padded // block_b, t_padded // block_t)
    itemsize = jnp.dtype(compute_dtype).itemsize

    # Scoped-VMEM budget: double-buffered s1 tile + resident weights/bias
    # + output block + running-max scratch (with margin).
    vmem_bytes = (2 * block_b * block_t * E * itemsize
                  + wc.size * itemsize + bc.size * 4
                  + block_b * n_pad * 4
                  + block_b * E * itemsize)
    vmem_limit = max(32 * 1024 * 1024, int(1.5 * vmem_bytes))

    cost = pl.CostEstimate(
        flops=2 * b_padded * E * n_pad + b_padded * t_padded * E,
        transcendentals=0,
        bytes_accessed=(s1p.size * itemsize + wc.size * itemsize
                        + bc.size * 4 + b_padded * n_pad * 4),
    )

    out = pl.pallas_call(
        nlinet_kernel,
        out_shape=jax.ShapeDtypeStruct((b_padded, n_pad), jnp.float32),
        grid_spec=pltpu.PrefetchScalarGridSpec(
            num_scalar_prefetch=0,
            grid=grid,
            in_specs=[
                # streamed input tile
                pl.BlockSpec((block_b, block_t, E), lambda i, t: (i, t, 0)),
                # resident collapsed weight / bias (constant block index)
                pl.BlockSpec((E, n_pad), lambda i, t: (0, 0)),
                pl.BlockSpec((1, n_pad), lambda i, t: (0, 0)),
            ],
            out_specs=pl.BlockSpec((block_b, n_pad), lambda i, t: (i, 0)),
            scratch_shapes=[pltpu.VMEM((block_b, E), compute_dtype)],
        ),
        compiler_params=pltpu.CompilerParams(
            dimension_semantics=("parallel", "arbitrary"),
            vmem_limit_bytes=vmem_limit,
        ),
        cost_estimate=cost,
    )(s1p, wc, bc)

    return out[:B, :n_classes]


def init_params(key, in_dim=320, fc_dim=64, n_classes=3):
    ks = jax.random.split(key, 6)
    scale1 = 1.0 / jnp.sqrt(in_dim)
    scale2 = 1.0 / jnp.sqrt(fc_dim)
    w1 = jax.random.uniform(ks[0], (in_dim, fc_dim), jnp.float32, -scale1, scale1)
    b1 = jax.random.uniform(ks[1], (1, fc_dim), jnp.float32, -scale1, scale1)
    w2 = jax.random.uniform(ks[2], (fc_dim, fc_dim), jnp.float32, -scale2, scale2)
    b2 = jax.random.uniform(ks[3], (1, fc_dim), jnp.float32, -scale2, scale2)
    w3 = jax.random.uniform(ks[4], (fc_dim, n_classes), jnp.float32, -scale2, scale2)
    b3 = jax.random.uniform(ks[5], (1, n_classes), jnp.float32, -scale2, scale2)
    return (w1, b1, w2, b2, w3, b3)


def reference_forward(s1, params):
    """Uncollapsed f32 reference: max-pool encoder + three chained Linears."""
    w1, b1, w2, b2, w3, b3 = params
    u = jnp.max(s1, axis=1)
    h1 = u @ w1 + b1
    h2 = h1 @ w2 + b2
    return h2 @ w3 + b3


def reference_forward_collapsed(s1, params, compute_dtype=jnp.bfloat16):
    """Reference matching the kernel's collapsed / reduced-precision path."""
    w1, b1, w2, b2, w3, b3 = params
    wc = (w1 @ w2 @ w3).astype(compute_dtype)
    bc = (b1 @ w2 @ w3 + b2 @ w3 + b3).astype(jnp.float32)
    u = jnp.max(s1.astype(compute_dtype), axis=1)
    return jnp.dot(u, wc, preferred_element_type=jnp.float32) + bc


if __name__ == "__main__":
    key = jax.random.PRNGKey(0)
    k_in, k_par, k_in2 = jax.random.split(key, 3)

    E, fc_dim, n_classes = 320, 64, 3
    params = init_params(k_par, in_dim=E, fc_dim=fc_dim, n_classes=n_classes)

    # --- small shape consistent with the module: B=2, T=8, E=320 -------------
    B, T = 2, 8
    s1 = jax.random.normal(k_in, (B, T, E), dtype=jnp.float32)

    out = jax.block_until_ready(nlinet_forward(s1, params))
    assert out.shape == (B, n_classes)

    ref_f32 = reference_forward(s1, params)
    ref_bf16 = reference_forward_collapsed(s1, params, jnp.bfloat16)
    assert jnp.allclose(out, ref_bf16, atol=2e-3, rtol=2e-3), \
        float(jnp.max(jnp.abs(out - ref_bf16)))
    assert jnp.allclose(out, ref_f32, atol=5e-2, rtol=5e-2), \
        float(jnp.max(jnp.abs(out - ref_f32)))

    # f32 streaming path matches the uncollapsed f32 reference tightly.
    out_f32 = jax.block_until_ready(
        nlinet_forward(s1, params, compute_dtype=jnp.float32))
    assert jnp.allclose(out_f32, ref_f32, atol=1e-4, rtol=1e-4), \
        float(jnp.max(jnp.abs(out_f32 - ref_f32)))

    # --- multi-tile grid with batch/time padding (exercises the pipeline) ----
    B2, T2 = 12, 20
    s1b = jax.random.normal(k_in2, (B2, T2, E), dtype=jnp.float32)
    out2 = jax.block_until_ready(
        nlinet_forward(s1b, params, block_b=8, block_t=8))
    assert out2.shape == (B2, n_classes)
    ref2 = reference_forward_collapsed(s1b, params, jnp.bfloat16)
    assert jnp.allclose(out2, ref2, atol=2e-3, rtol=2e-3), \
        float(jnp.max(jnp.abs(out2 - ref2)))
    assert jnp.allclose(out2, reference_forward(s1b, params),
                        atol=5e-2, rtol=5e-2)

    print("KERNEL_OK")
</pallas_src>

<mosaic_0001>
module attributes {stable_mosaic.version = 11 : i64} {
  func.func @nlinet_kernel(%arg0: i32, %arg1: i32, %arg2: memref<2x8x320xbf16, #tpu.memory_space<vmem>>, %arg3: memref<320x128xbf16, #tpu.memory_space<vmem>>, %arg4: memref<1x128xf32, #tpu.memory_space<vmem>>, %arg5: memref<2x128xf32, #tpu.memory_space<vmem>>, %arg6: memref<2x320xbf16, #tpu.memory_space<vmem>>) attributes {dimension_semantics = [#tpu.dimension_semantics<parallel>, #tpu.dimension_semantics<arbitrary>], iteration_bounds = array<i64: 1, 1>, scalar_prefetch = 0 : i64, scratch_operands = 1 : i64, tpu.core_type = #tpu.core_type<tc>, window_params = [{transform_indices = @transform_0, window_bounds = array<i64: 2, 8, 320>}, {pipeline_mode = #tpu.pipeline_mode<synchronous>, transform_indices = @transform_1, window_bounds = array<i64: 320, 128>}, {pipeline_mode = #tpu.pipeline_mode<synchronous>, transform_indices = @transform_2, window_bounds = array<i64: 1, 128>}, {transform_indices = @transform_3, window_bounds = array<i64: 2, 128>}]} {
    %c0_i32 = arith.constant 0 : i32
    %0 = arith.cmpi eq, %arg1, %c0_i32 : i32
    %1 = arith.extui %0 : i1 to i32
    %c0_i32_0 = arith.constant 0 : i32
    %2 = arith.cmpi ne, %1, %c0_i32_0 : i32
    scf.if %2 {
      %cst_9 = arith.constant 0xFF80 : bf16
      %11 = vector.broadcast %cst_9 : bf16 to vector<2x320xbf16>
      %c0_10 = arith.constant 0 : index
      %c0_11 = arith.constant 0 : index
      %12 = vector.load %arg6[%c0_10, %c0_11] : memref<2x320xbf16, #tpu.memory_space<vmem>>, vector<2x320xbf16>
      tpu.vector_store %arg6[%c0_10, %c0_11], %11 {strides = array<i32>} : memref<2x320xbf16, #tpu.memory_space<vmem>>, vector<2x320xbf16>,
    } else {
    }
    %c0 = arith.constant 0 : index
    %c0_1 = arith.constant 0 : index
    %3 = vector.load %arg6[%c0, %c0_1] : memref<2x320xbf16, #tpu.memory_space<vmem>>, vector<2x320xbf16>
    %c0_2 = arith.constant 0 : index
    %c0_3 = arith.constant 0 : index
    %c0_4 = arith.constant 0 : index
    %4 = vector.load %arg2[%c0_2, %c0_3, %c0_4] : memref<2x8x320xbf16, #tpu.memory_space<vmem>>, vector<2x8x320xbf16>
    %cst = arith.constant dense<0xFF80> : vector<2x320xbf16>
    %5 = vector.multi_reduction <maximumf>, %4, %cst [1] : vector<2x8x320xbf16> to vector<2x320xbf16>
    %6 = arith.maximumf %3, %5 : vector<2x320xbf16>
    %c0_5 = arith.constant 0 : index
    %c0_6 = arith.constant 0 : index
    %7 = vector.load %arg6[%c0_5, %c0_6] : memref<2x320xbf16, #tpu.memory_space<vmem>>, vector<2x320xbf16>
    tpu.vector_store %arg6[%c0_5, %c0_6], %6 {strides = array<i32>} : memref<2x320xbf16, #tpu.memory_space<vmem>>, vector<2x320xbf16>,
    %c0_i32_7 = arith.constant 0 : i32
    %8 = arith.cmpi eq, %arg1, %c0_i32_7 : i32
    %9 = arith.extui %8 : i1 to i32
    %c0_i32_8 = arith.constant 0 : i32
    %10 = arith.cmpi ne, %9, %c0_i32_8 : i32
    scf.if %10 {
      %c0_9 = arith.constant 0 : index
      %c0_10 = arith.constant 0 : index
      %11 = vector.load %arg6[%c0_9, %c0_10] : memref<2x320xbf16, #tpu.memory_space<vmem>>, vector<2x320xbf16>
      %c0_11 = arith.constant 0 : index
      %c0_12 = arith.constant 0 : index
      %12 = vector.load %arg3[%c0_11, %c0_12] : memref<320x128xbf16, #tpu.memory_space<vmem>>, vector<320x128xbf16>
      %cst_13 = arith.constant dense<0.000000e+00> : vector<2x128xf32>
      %13 = tpu.matmul %11, %12, %cst_13 {dimension_numbers = #tpu.dot_dimension_numbers<[1], [0], [0], [1], [0, 0, 1, 1], [], []>} : vector<2x320xbf16>, vector<320x128xbf16>, vector<2x128xf32> -> vector<2x128xf32>
      %c0_14 = arith.constant 0 : index
      %c0_15 = arith.constant 0 : index
      %14 = vector.load %arg4[%c0_14, %c0_15] : memref<1x128xf32, #tpu.memory_space<vmem>>, vector<1x128xf32>
      %15 = vector.broadcast %14 : vector<1x128xf32> to vector<2x128xf32>
      %16 = arith.addf %13, %15 : vector<2x128xf32>
      %c0_16 = arith.constant 0 : index
      %c0_17 = arith.constant 0 : index
      %17 = vector.load %arg5[%c0_16, %c0_17] : memref<2x128xf32, #tpu.memory_space<vmem>>, vector<2x128xf32>
      tpu.vector_store %arg5[%c0_16, %c0_17], %16 {strides = array<i32>} : memref<2x128xf32, #tpu.memory_space<vmem>>, vector<2x128xf32>,
    } else {
    }
    return
  }
  func.func @transform_0(%arg0: i32, %arg1: i32) -> (i32, i32, i32) {
    %c0_i32 = arith.constant 0 : i32
    %c0_i32_0 = arith.constant 0 : i32
    return %arg0, %arg1, %c0_i32 : i32, i32, i32
  }
  func.func @transform_1(%arg0: i32, %arg1: i32) -> (i32, i32) {
    %c0_i32 = arith.constant 0 : i32
    %c0_i32_0 = arith.constant 0 : i32
    %c0_i32_1 = arith.constant 0 : i32
    return %c0_i32, %c0_i32_0 : i32, i32
  }
  func.func @transform_2(%arg0: i32, %arg1: i32) -> (i32, i32) {
    %c0_i32 = arith.constant 0 : i32
    %c0_i32_0 = arith.constant 0 : i32
    %c0_i32_1 = arith.constant 0 : i32
    return %c0_i32, %c0_i32_0 : i32, i32
  }
  func.func @transform_3(%arg0: i32, %arg1: i32) -> (i32, i32) {
    %c0_i32 = arith.constant 0 : i32
    %c0_i32_0 = arith.constant 0 : i32
    return %arg0, %c0_i32 : i32, i32
  }
}

</mosaic_0001>

<bundles_post_ra>
// kernel: tpu_custom_call.1
= control target key start
LH: loop header
LB: loop body
LE: loop exit
PB: predicated region body
PF: predicated region fallthrough
CT: control target
= control target key end

     0   :  { %8 = vsyncpa [#allocation4], 0  ;;  %s862_s0 = inlined_call_operand.hbm [shape: bf16[2,8,320], index: 0, kind: input, shape index: {}]   ;;  %s863_s1 = inlined_call_operand.hbm [shape: bf16[320,128], index: 1, kind: input, shape index: {}]   ;;  %s864_s2 = inlined_call_operand.vmem [shape: f32[1,128], index: 2, kind: input, shape index: {}]   ;;  %s865_s3 = inlined_call_operand.hbm [shape: f32[2,128], index: 3, kind: output, shape index: {}]  }
   0x1   :  { %9 = vsyncpa [#allocation7], 0 }
   0x2   :  { %10 = vsyncpa [#allocation5], 0  ;;  %s773_s12 = smov [#allocation3]   ;;  %s701_s16 = scalar_lea.hbm %s862_s0, 384 }
   0x3   :  { %s16_s13 = sshll.u32 %s773_s12, 4  ;;  %p702_p0 = scmp.ne.s32.totalorder %s862_s0, %s701_s16  ;;  %s17_s13 = int_to_ptr.vmem [resolvable:$true] %s16_s13 }
   0x4   :  { %p705_p1 = scmp.lt.u32.totalorder %s701_s16, %s862_s0 }
   0x6   :  { %p707_p2 = pnand %p705_p1, %p702_p0 }
   0x8   :  { %710 = shalt.err (!%p707_p2)
}
   0x9   :  { %s711_s21 = scalar_lea.vmem %s17_s13, 384  ;;  %p716_p4 = scmp.lt.s32.totalorder %s17_s13, %s17_s13 }
   0xa   :  { %p712_p3 = scmp.ne.s32.totalorder %s17_s13, %s711_s21  ;;  %p717_p5 = scmp.lt.s32.totalorder %s711_s21, %s711_s21 }
   0xc   :  { %p718_p6 = por %p717_p5, %p716_p4 }
   0xe   :  { %p719_p7 = pnand %p718_p6, %p712_p3 }
  0x10   :  { %722 = shalt.err (!%p719_p7)
}
  0x11   :  { %s774_s22 = smov 192   ;;  %s775_s23 = smov 12  }
  0x12   :  { %22 = dma.hbm_to_vmem [thread:$0]  %s862_s0, 384, %s17_s13, [#allocation4], %s774_s22, %s774_s22, %s775_s23  }
  0x13   :  { %s776_s26 = smov [#allocation6]   ;;  %s723_s30 = scalar_lea.hbm %s863_s1, 2560 }
  0x14   :  { %s28_s27 = sshll.u32 %s776_s26, 4  ;;  %p724_p8 = scmp.ne.s32.totalorder %s863_s1, %s723_s30  ;;  %s29_s27 = int_to_ptr.vmem [resolvable:$true] %s28_s27 }
  0x15   :  { %p727_p9 = scmp.lt.u32.totalorder %s723_s30, %s863_s1 }
  0x17   :  { %p729_p10 = pnand %p727_p9, %p724_p8 }
  0x19   :  { %732 = shalt.err (!%p729_p10)
}
  0x1a   :  { %s733_s8 = scalar_lea.vmem %s29_s27, 2560  ;;  %p738_p12 = scmp.lt.s32.totalorder %s29_s27, %s29_s27 }
  0x1b   :  { %p734_p11 = scmp.ne.s32.totalorder %s29_s27, %s733_s8  ;;  %p739_p13 = scmp.lt.s32.totalorder %s733_s8, %s733_s8 }
  0x1d   :  { %p740_p0 = por %p739_p13, %p738_p12 }
  0x1f   :  { %p741_p1 = pnand %p740_p0, %p734_p11 }
  0x21   :  { %744 = shalt.err (!%p741_p1)
}
  0x22   :  { %s777_s0 = smov 64   ;;  %s778_s9 = smov 4  }
  0x23   :  { %34 = dma.hbm_to_vmem [thread:$0]  %s863_s1, 2560, %s29_s27, [#allocation7], %s777_s0, %s777_s0, %s778_s9  }
  0x24   :  { %767 = dma.done.wait [#allocation4], 384  }
  0x25   :  { %768 = vsyncadd [#allocation4], 4294966912 }
  0x26   :  { %769 = dma.done.wait [#allocation7], 2560  }
  0x27   :  { %770 = vsyncadd [#allocation7], 4294964736  ;;  %vm49_vm0 = vcmask 1040384   ;;  %vm50_vm1 = vcmask 1041409   ;;  %vm52_vm2 = vcmask 518146   ;;  %v779_v0 = vmov 0.0  }
  0x28   :  { %651 = vmatprep.subr.bf16.mxu1 %v779_v0  ;;  %vm51_vm3 = vmor %vm50_vm1, %vm49_vm0  ;;  %v780_v2 = vmov 4286644096   ;;  %vm781_vm5 = vmmov 0   ;;  %v675_v3 = vld [vmem:[#allocation6 + $0x40] sm:$0xff]   ;;  %v677_v5 = vld [vmem:[#allocation6 + $0x48] sm:$0xff]   ;;  %vm76_vm6 = vcmask 1043456  }
  0x29   :  { %vm830_vm4 = vmor %vm52_vm2, %vm51_vm3  ;;  %659 = vmatprep.mubr.msk.bf16.mxu1 %vm781_vm5, %v779_v0  ;;  %v676_v4 = vld [vmem:[#allocation6] sm:$0xff]   ;;  %624 = vmatprep.subr.bf16.mxu0 %v675_v3  ;;  %v678_v6 = vld [vmem:[#allocation6 + $0x8] sm:$0xff]   ;;  %vm104_vm7 = vcmask 519168   ;;  %v782_v3 = vmov 1966171168   ;;  %vm494_vm8 = vcmask 523264  }
  0x2a   :  { %54 = vst.msk [vmem:[#allocation2] sm:$0x7] %vm830_vm4, %v780_v2  ;;  %625 = vmatpush3.bf16.msra.mxu0 %v676_v4  ;;  %v679_v7 = vld [vmem:[#allocation6 + $0x50] sm:$0xff]   ;;  %v681_v9 = vld [vmem:[#allocation6 + $0x58] sm:$0xff]   ;;  %v685_v10 = vld [vmem:[#allocation6 + $0x80] sm:$0xff]   ;;  %v165_v4 = vunpack.c.l.s4 %v782_v3  ;;  %s784_s13 = smov [#allocation8]  }
  0x2b   :  { %626 = vmatprep.subr.bf16.mxu0 %v677_v5  ;;  %v680_v8 = vld [vmem:[#allocation6 + $0x10] sm:$0xff]   ;;  %v682_v11 = vld [vmem:[#allocation6 + $0x18] sm:$0xff]   ;;  %v683_v12 = vld [vmem:[#allocation6 + $0x60] sm:$0xff]   ;;  %652 = vmatpush3.bf16.msra.mxu1 %v685_v10  ;;  %s585_s14 = sshll.u32 %s784_s13, 4  ;;  %s586_s14 = int_to_ptr.vmem [resolvable:$true] %s585_s14 }
  0x2c   :  { %653 = vmatprep.subr.bf16.mxu1 %v779_v0  ;;  %v688_v13 = vld [vmem:[#allocation6 + $0x88] sm:$0xff]   ;;  %v684_v14 = vld [vmem:[#allocation6 + $0x20] sm:$0xff]   ;;  %v691_v16 = vld [vmem:[#allocation6 + $0x90] sm:$0xff]   ;;  %s745_s15 = scalar_lea.vmem %s586_s14, 32  ;;  %p750_p3 = scmp.lt.s32.totalorder %s586_s14, %s586_s14 }
  0x2d   :  { %v686_v15 = vld [vmem:[#allocation6 + $0x68] sm:$0xff]   ;;  %v689_v18 = vld [vmem:[#allocation6 + $0x70] sm:$0xff]   ;;  %v699_v26 = vld [vmem:[#allocation3 + $0x14] ss:$0 sps:$4 sm:$0xff]   ;;  %p746_p2 = scmp.ne.s32.totalorder %s586_s14, %s745_s15  ;;  %p751_p4 = scmp.lt.s32.totalorder %s745_s15, %s745_s15 }
  0x2e   :  { %627 = vmatpush3.bf16.msra.mxu0 %v678_v6  ;;  %v687_v17 = vld [vmem:[#allocation6 + $0x28] sm:$0xff]   ;;  %v58_v20 = vld [vmem:[#allocation3 + $0xc] sm:$0xff]  ;;  %v696_v23 = vld [vmem:[#allocation3 + $0x8] ss:$0 sps:$4 sm:$0xff]   ;;  %v145_v48 = vsel %vm104_vm7, %v699_v26, 4286644096 }
  0x2f   :  { %628 = vmatprep.subr.bf16.mxu0 %v679_v7  ;;  %654 = vmatpush3.bf16.msra.mxu1 %v688_v13  ;;  %v56_v19 = vld [vmem:[#allocation3] sm:$0xff]  ;;  %v598_v24 = vcombine.low %v58_v20, %v58_v20  ;;  %v599_v25 = vcombine.high %v58_v20, %v58_v20  ;;  %v106_v29 = vsel %vm104_vm7, %v696_v23, 4286644096  ;;  %v690_v30 = vld [vmem:[#allocation6 + $0x30] sm:$0xff]   ;;  %v700_v35 = vld [vmem:[#allocation6 + $0x98] sm:$0xff]   ;;  %v147_v53 = vunpack.i.l.bf16 %v145_v48  ;;  %p752_p5 = por %p751_p4, %p750_p3 }
  0x30   :  { %655 = vmatprep.subr.bf16.mxu1 %v779_v0  ;;  %v595_v21 = vcombine.low %v56_v19, %v56_v19  ;;  %v596_v22 = vcombine.high %v56_v19, %v56_v19  ;;  %v692_v36 = vld [vmem:[#allocation6 + $0x78] sm:$0xff]   ;;  %v108_v37 = vunpack.i.l.bf16 %v106_v29  ;;  %v109_v38 = vunpack.i.h.bf16 %v106_v29 }
  0x31   :  { %v119_v39 = vsel %vm76_vm6, %v598_v24, 4286644096  ;;  %v132_v40 = vsel %vm76_vm6, %v599_v25, 4286644096  ;;  %v693_v49 = vld [vmem:[#allocation6 + $0x38] sm:$0xff]   ;;  %v148_v56 = vunpack.i.h.bf16 %v145_v48  ;;  %p753_p6 = pnand %p752_p5, %p746_p2 }
  0x32   :  { %629 = vmatpush3.bf16.msra.mxu0 %v680_v8  ;;  %v79_v27 = vsel %vm76_vm6, %v595_v21, 4286644096  ;;  %v92_v28 = vsel %vm76_vm6, %v596_v22, 4286644096  ;;  %v121_v43 = vunpack.i.l.bf16 %v119_v39  ;;  %v122_v44 = vunpack.i.h.bf16 %v119_v39 }
  0x33   :  { %630 = vmatprep.subr.bf16.mxu0 %v681_v9  ;;  %656 = vmatpush3.bf16.msra.mxu1 %v691_v16  ;;  %v81_v31 = vunpack.i.l.bf16 %v79_v27  ;;  %v82_v32 = vunpack.i.h.bf16 %v79_v27  ;;  %v94_v33 = vunpack.i.l.bf16 %v92_v28  ;;  %v95_v34 = vunpack.i.h.bf16 %v92_v28 }
  0x34   :  { %657 = vmatprep.subr.bf16.mxu1 %v779_v0  ;;  %v110_v45 = vmax.f32 %v108_v37, %v109_v38  ;;  %v134_v46 = vunpack.i.l.bf16 %v132_v40  ;;  %v135_v47 = vunpack.i.h.bf16 %v132_v40  ;;  %v123_v52 = vmax.f32 %v121_v43, %v122_v44 }
  0x35   :  { %v83_v41 = vmax.f32 %v81_v31, %v82_v32  ;;  %v96_v42 = vmax.f32 %v94_v33, %v95_v34  ;;  %v149_v62 = vmax.f32 %v147_v53, %v148_v56  ;;  %v167_v8 = vlaneseq }
  0x36   :  { %631 = vmatpush3.bf16.msra.mxu0 %v682_v11  ;;  %v111_v54 = vrot.slane %v110_v45, 4  ;;  %v136_v55 = vmax.f32 %v134_v46, %v135_v47  ;;  %v124_v59 = vrot.slane %v123_v52, 4  ;;  %v783_v32 = vmov 1935823168  }
  0x37   :  { %632 = vmatprep.subr.bf16.mxu0 %v683_v12  ;;  %658 = vmatpush3.bf16.msra.mxu1 %v700_v35  ;;  %v84_v50 = vrot.slane %v83_v41, 4  ;;  %v97_v51 = vrot.slane %v96_v42, 4  ;;  %v150_v7 = vrot.slane %v149_v62, 4  ;;  %v168_v22 = vshrl.u32 %v167_v8, 7 }
  0x38   :  { %v112_v60 = vmax.f32 %v110_v45, %v111_v54  ;;  %v137_v61 = vrot.slane %v136_v55, 4  ;;  %v125_v2 = vmax.f32 %v123_v52, %v124_v59  ;;  %v210_v33 = vunpack.c.l.s4 %v783_v32 }
  0x39   :  { %v85_v57 = vmax.f32 %v83_v41, %v84_v50  ;;  %v98_v58 = vmax.f32 %v96_v42, %v97_v51 }
  0x3a   :  { %633 = vmatpush3.bf16.msra.mxu0 %v684_v14  ;;  %v113_v5 = vrot.slane %v112_v60, 2  ;;  %v138_v6 = vmax.f32 %v136_v55, %v137_v61  ;;  %v126_v11 = vrot.slane %v125_v2, 2  ;;  %v151_v14 = vmax.f32 %v149_v62, %v150_v7 }
  0x3b   :  { %634 = vmatprep.subr.bf16.mxu0 %v686_v15  ;;  %v86_v63 = vrot.slane %v85_v57, 2  ;;  %v99_v0 = vrot.slane %v98_v58, 2  ;;  %v211_v44 = vunpack.c.0.s8 %v210_v33 }
  0x3c   :  { %v114_v12 = vmax.f32 %v112_v60, %v113_v5  ;;  %v139_v13 = vrot.slane %v138_v6, 2  ;;  %v152_v21 = vrot.slane %v151_v14, 2 }
  0x3d   :  { %v87_v9 = vmax.f32 %v85_v57, %v86_v63  ;;  %v100_v10 = vmax.f32 %v98_v58, %v99_v0  ;;  %v214_v51 = vsub.s32 %v211_v44, %v168_v22 }
  0x3e   :  { %635 = vmatpush3.bf16.msra.mxu0 %v687_v17  ;;  %v127_v17 = vmax.f32 %v125_v2, %v126_v11  ;;  %v115_v19 = vrot.slane %v114_v12, 1  ;;  %v140_v20 = vmax.f32 %v138_v6, %v139_v13  ;;  %v153_v28 = vmax.f32 %v151_v14, %v152_v21 }
  0x3f   :  { %636 = vmatprep.subr.bf16.mxu0 %v689_v18  ;;  %v88_v15 = vrot.slane %v87_v9, 1  ;;  %v101_v16 = vrot.slane %v100_v10, 1  ;;  %v166_v18 = vunpack.c.0.s8 %v165_v4 }
  0x40   :  { %v128_v25 = vrot.slane %v127_v17, 1  ;;  %v116_v26 = vmax.f32 %v114_v12, %v115_v19  ;;  %v141_v27 = vrot.slane %v140_v20, 1 }
  0x41   :  { %v89_v23 = vmax.f32 %v87_v9, %v88_v15  ;;  %v102_v24 = vmax.f32 %v100_v10, %v101_v16  ;;  %v169_v37 = vsub.s32 %v166_v18, %v168_v22  ;;  %v55_v16 = vld [vmem:[#allocation2] sm:$0x7] }
  0x42   :  { %637 = vmatpush3.bf16.msra.mxu0 %v690_v30  ;;  %v129_v31 = vmax.f32 %v127_v17, %v128_v25  ;;  %v117_v34 = vpack.i.bf16 %v116_v26, %v116_v26  ;;  %v142_v35 = vmax.f32 %v140_v20, %v141_v27 }
  0x43   :  { %638 = vmatprep.subr.bf16.mxu0 %v692_v36  ;;  %v90_v29 = vpack.i.bf16 %v89_v23, %v89_v23  ;;  %v103_v30 = vpack.i.bf16 %v102_v24, %v102_v24  ;;  %v154_v36 = vrot.slane %v153_v28, 1 }
  0x44   :  { %v130_v38 = vpack.i.bf16 %v129_v31, %v129_v31  ;;  %v143_v40 = vpack.i.bf16 %v142_v35, %v142_v35  ;;  %v177_v42 = vrot.slane %v117_v34, %v169_v37 }
  0x45   :  { %v163_v39 = vcombine.low %v90_v29, %v103_v30  ;;  %v155_v41 = vmax.f32 %v153_v28, %v154_v36  ;;  %v601_v28 = vld [vmem:[%s864_s2] ss:$0 sm:$0xff] }
  0x46   :  { %639 = vmatpush3.bf16.msra.mxu0 %v693_v49  ;;  %v186_v46 = vcombine.low %v130_v38, %v143_v40 }
  0x47   :  { %v170_v43 = vrot.slane %v163_v39, %v169_v37  ;;  %v156_v45 = vpack.i.bf16 %v155_v41, %v155_v41 }
  0x48   :  { %v193_v48 = vrot.slane %v186_v46, %v169_v37 }
  0x49   :  { %v178_v47 = vcombine.low %v170_v43, %v177_v42  ;;  %v200_v49 = vrot.slane %v156_v45, %v169_v37 }
  0x4b   :  { %v185_v50 = vrot.slane %v178_v47, %v169_v37  ;;  %v201_v52 = vcombine.low %v193_v48, %v200_v49 }
  0x4d   :  { %v215_v53 = vrot.slane %v185_v50, %v214_v51  ;;  %v208_v54 = vrot.slane %v201_v52, %v169_v37 }
  0x4f   :  { %v216_v55 = vcombine.high %v215_v53, %v215_v53  ;;  %v223_v56 = vrot.slane %v215_v53, %v214_v51  ;;  %v237_v57 = vrot.slane %v208_v54, %v214_v51 }
  0x51   :  { %v230_v58 = vrot.slane %v216_v55, %v214_v51  ;;  %v238_v59 = vcombine.high %v237_v57, %v237_v57  ;;  %v245_v60 = vrot.slane %v237_v57, %v214_v51  ;;  %v253_v61 = vunpack.c.l.b16 %v223_v56 }
  0x52   :  { %v254_v63 = vunpack.c.h.b16 %v223_v56 }
  0x53   :  { %v252_v62 = vrot.slane %v238_v59, %v214_v51  ;;  %v256_v0 = vunpack.c.l.b16 %v245_v60  ;;  %v257_v2 = vunpack.c.h.b16 %v245_v60  ;;  %v255_v3 = vunpack.c.l.b16 %v230_v58 }
  0x55   :  { %v258_v4 = vunpack.c.l.b16 %v252_v62  ;;  %v259_v5 = vrot.slane %v256_v0, 7  ;;  %v262_v6 = vrot.slane %v257_v2, 7 }
  0x57   :  { %v261_v7 = vsel %vm50_vm1, %v259_v5, %v253_v61  ;;  %v263_v8 = vsel %vm50_vm1, %v262_v6, %v254_v63  ;;  %v264_v9 = vrot.slane %v258_v4, 7 }
  0x58   :  { %v266_v10 = vpack.c.b16 %v263_v8, %v261_v7 }
  0x59   :  { %v265_v11 = vsel %vm50_vm1, %v264_v9, %v255_v3 }
  0x5a   :  { %v267_v12 = vpack.c.b16 %v265_v11, %v265_v11  ;;  %v274_v13 = vrot.slane %v266_v10, %v169_v37 }
  0x5c   :  { %v281_v14 = vrot.slane %v267_v12, %v169_v37 }
  0x5e   :  { %v282_v15 = vcombine.low %v274_v13, %v281_v14 }
  0x60   :  { %v289_v17 = vrot.slane %v282_v15, %v169_v37 }
  0x62   :  { %v291_v18 = vmax.bf16 %v289_v17, %v55_v16 }
  0x64   :  { %296 = vst.msk [vmem:[#allocation2] sm:$0x7] %vm830_vm4, %v291_v18 }
  0x6b   :  { %v602_v19 = vld.sshfl [vmem:[#allocation2] sm:$0x13 pattern:$0x75316420] }
  0x6c   :  { %v356_v20 = vcombine.high %v602_v19, %v602_v19  ;;  %v363_v21 = vrot.slane %v602_v19, %v169_v37 }
  0x6e   :  { %v370_v22 = vrot.slane %v356_v20, %v169_v37  ;;  %v371_v23 = vcombine.high %v363_v21, %v363_v21 }
  0x70   :  { %530 = vmatprep.mubr.bf16.mxu0 %v370_v22  ;;  %660 = vmatmul.mubr.msk.bf16.vlgmr.msra.gmra.mrb[0].mxu1 %vm494_vm8, %v371_v23 }
  0x71   :  { %531 = vmatmul.mubr.bf16.vlgmr.msra.gmra.mrb[0].mxu0 %v363_v21 }
 0x143   :  { %v572_v24 = vpop.f32.mrb[0].mxu1 }
 0x144   :  { %v640_v25 = vpop.f32.mrb[0].mxu0  ;;  %v661_v26 = vpop.f32.mrb[1].mxu1 }
 0x145   :  { %v641_v27 = vpop.f32.mrb[1].mxu0  ;;  %v575_v29 = vpop.f32.mrb[2].mxu1 }
 0x146   :  { %v642_v1 = vadd.f32 %v641_v27, %v640_v25  ;;  %v643_v30 = vpop.f32.mrb[2].mxu0  ;;  %v662_v31 = vpop.f32.mrb[3].mxu1 }
 0x147   :  { %v644_v32 = vpop.f32.mrb[3].mxu0 }
 0x148   :  { %v533_v33 = vadd.f32 %v642_v1, %v601_v28 }
 0x14a   :  { %v573_v34 = vadd.f32 %v572_v24, %v533_v33 }
 0x14c   :  { %578 = vst [vmem:[#allocation8] sm:$0x3] %v573_v34 }
 0x14d   :  { %756 = shalt.err (!%p753_p6)
}
 0x14e   :  { %s757_s17 = scalar_lea.hbm %s865_s3, 32 }
 0x14f   :  { %p758_p7 = scmp.ne.s32.totalorder %s865_s3, %s757_s17  ;;  %p761_p8 = scmp.lt.u32.totalorder %s757_s17, %s865_s3 }
 0x151   :  { %p763_p9 = pnand %p761_p8, %p758_p7 }
 0x153   :  { %766 = shalt.err (!%p763_p9)
}
 0x154   :  { %588 = dma.vmem_to_hbm [thread:$0]  %s586_s14, 32, %s865_s3, [#allocation5]  }
 0x155   :  { %771 = dma.done.wait [#allocation5], 32  }
 0x156   :  { %772 = vsyncadd [#allocation5], 4294967264 }
 0x157   :  { %592 = vsyncpa [#allocation4], 1 }
 0x158   :  { %593 = vsyncpa [#allocation7], 1 }
 0x159   :  { %594 = vsyncpa [#allocation5], 1 }

</bundles_post_ra>
